<compile_context>
chip_gen: v5e
topology: v5e:2x2
jax: 0.10.0
libtpu: 0.0.40
codegen_flags: <defaults>
</compile_context>

<pallas_src>
import functools

import jax
import jax.numpy as jnp
from jax.experimental import pallas as pl
from jax.experimental.pallas import tpu as pltpu


def _round_up(n: int, m: int) -> int:
    return (n + m - 1) // m * m


# --------------------------------------------------------------------------
# Kernel
# --------------------------------------------------------------------------
def _generator_kernel(x_ref, m_ref,
                      w1_ref, b1_ref,
                      w2_ref, b2_ref,
                      w3_ref, b3_ref,
                      gen_ref, comb_ref):
    x = x_ref[...]          # features_noise tile  [bB, Fp] f32
    m = m_ref[...]          # missing_mask  tile   [bB, Fp] f32

    # ---- layer 1: in-VMEM concat (lane concat at 128 boundary) + one dot ----
    xm = jnp.concatenate([x, m], axis=1).astype(w1_ref.dtype)      # [bB, 2*Fp] bf16
    h1 = jnp.dot(xm, w1_ref[...], preferred_element_type=jnp.float32) + b1_ref[...]
    h1 = jnp.maximum(h1, 0.0)

    # ---- layer 2 ----
    h2 = jnp.dot(h1.astype(w2_ref.dtype), w2_ref[...],
                 preferred_element_type=jnp.float32) + b2_ref[...]
    h2 = jnp.maximum(h2, 0.0)

    # ---- output layer: sigmoid via EUP exp + approx reciprocal ----
    logits = jnp.dot(h2.astype(w3_ref.dtype), w3_ref[...],
                     preferred_element_type=jnp.float32) + b3_ref[...]
    gen = pl.reciprocal(1.0 + jnp.exp(-logits), approx=True)

    gen_ref[...] = gen.astype(gen_ref.dtype)
    # comb = x*m + gen*(1-m)  ==  gen + m*(x - gen)
    comb_ref[...] = (gen + m * (x - gen)).astype(comb_ref.dtype)


# --------------------------------------------------------------------------
# Wrapper
# --------------------------------------------------------------------------
@functools.partial(jax.jit, static_argnames=("single_buffer_weights",))
def _forward_impl(features_noise, missing_mask, pp, *, single_buffer_weights):
    B, F = features_noise.shape
    H1p = pp["w1"].shape[1]
    H2p = pp["w2"].shape[1]
    Fp = pp["w3"].shape[1]

    # Pad batch to a sublane multiple and features to the padded lane width.
    Bp = _round_up(B, 8)
    x = jnp.pad(features_noise.astype(jnp.float32), ((0, Bp - B), (0, Fp - F)))
    m = jnp.pad(missing_mask.astype(jnp.float32), ((0, Bp - B), (0, Fp - F)))

    # Large batch tiles (amortize ~0.35us/step overhead); keep >=2 grid steps
    # for big batches so the parallel axis can shard across v7x's 2 TCs.
    if Bp <= 1024:
        block_b = Bp
    else:
        block_b = min(2048, _round_up(pl.cdiv(Bp, 2), 8))
    grid_b = pl.cdiv(Bp, block_b)

    # Weights / biases never change block index -> single-buffer them.
    w_mode = dict(pipeline_mode=pl.Buffered(1)) if single_buffer_weights else {}

    in_specs = [
        pl.BlockSpec((block_b, Fp), lambda i: (i, 0)),               # noise
        pl.BlockSpec((block_b, Fp), lambda i: (i, 0)),               # mask
        pl.BlockSpec((2 * Fp, H1p), lambda i: (0, 0), **w_mode),     # W1 (padded)
        pl.BlockSpec((1, H1p), lambda i: (0, 0), **w_mode),          # b1
        pl.BlockSpec((H1p, H2p), lambda i: (0, 0), **w_mode),        # W2
        pl.BlockSpec((1, H2p), lambda i: (0, 0), **w_mode),          # b2
        pl.BlockSpec((H2p, Fp), lambda i: (0, 0), **w_mode),         # W3
        pl.BlockSpec((1, Fp), lambda i: (0, 0), **w_mode),           # b3
    ]
    out_specs = (
        pl.BlockSpec((block_b, Fp), lambda i: (i, 0)),               # gen
        pl.BlockSpec((block_b, Fp), lambda i: (i, 0)),               # comb
    )

    gen_p, comb_p = pl.pallas_call(
        _generator_kernel,
        out_shape=(jax.ShapeDtypeStruct((Bp, Fp), jnp.float32),
                   jax.ShapeDtypeStruct((Bp, Fp), jnp.float32)),
        grid=(grid_b,),
        in_specs=in_specs,
        out_specs=out_specs,
        compiler_params=pltpu.CompilerParams(
            dimension_semantics=("parallel",),
            vmem_limit_bytes=48 * 1024 * 1024),
    )(x, m, pp["w1"], pp["b1"], pp["w2"], pp["b2"], pp["w3"], pp["b3"])

    return gen_p[:B, :F], comb_p[:B, :F]


def generator_forward(features_noise, missing_mask, padded_params):
    try:
        return _forward_impl(features_noise, missing_mask, padded_params,
                             single_buffer_weights=True)
    except Exception:
        # Fallback if pipeline_mode=pl.Buffered(1) is unsupported by this jax:
        # identical numerics, default (double) buffering of the weights.
        return _forward_impl(features_noise, missing_mask, padded_params,
                             single_buffer_weights=False)


# --------------------------------------------------------------------------
# Parameters
# --------------------------------------------------------------------------
def init_params(key, number_features, hidden_dimension_1, hidden_dimension_2):
    """Deterministic xavier-style init matching xavier_initialization()."""
    k1, k2, k3 = jax.random.split(key, 3)

    def xavier(k, size):
        std = 1.0 / jnp.sqrt(size[0] / 2.0)
        return jax.random.normal(k, size, dtype=jnp.float32) * std

    return {
        "w1": xavier(k1, (number_features * 2, hidden_dimension_1)),
        "w2": xavier(k2, (hidden_dimension_1, hidden_dimension_2)),
        "w3": xavier(k3, (hidden_dimension_2, number_features)),
        "b1": jnp.zeros((hidden_dimension_1,), jnp.float32),
        "b2": jnp.zeros((hidden_dimension_2,), jnp.float32),
        "b3": jnp.zeros((number_features,), jnp.float32),
    }


def pad_params(params, dtype=jnp.bfloat16):
    """One-time prep: zero-pad dims to multiples of 128, cast weights to bf16.

    Zero padding is exact through relu/sigmoid-and-slice, so the padded kernel
    reproduces the unpadded math on the logical sub-block.
    """
    F2, H1 = params["w1"].shape
    F = F2 // 2
    H2 = params["w2"].shape[1]
    Fp, H1p, H2p = _round_up(F, 128), _round_up(H1, 128), _round_up(H2, 128)

    # Re-split W1 so rows [0:Fp) act on noise and rows [Fp:2Fp) act on mask.
    w1_top = jnp.zeros((Fp, H1p), dtype).at[:F, :H1].set(params["w1"][:F].astype(dtype))
    w1_bot = jnp.zeros((Fp, H1p), dtype).at[:F, :H1].set(params["w1"][F:].astype(dtype))
    return {
        "w1": jnp.concatenate([w1_top, w1_bot], axis=0),                       # [2Fp, H1p]
        "w2": jnp.zeros((H1p, H2p), dtype).at[:H1, :H2].set(params["w2"].astype(dtype)),
        "w3": jnp.zeros((H2p, Fp), dtype).at[:H2, :F].set(params["w3"].astype(dtype)),
        "b1": jnp.zeros((1, H1p), jnp.float32).at[0, :H1].set(params["b1"]),
        "b2": jnp.zeros((1, H2p), jnp.float32).at[0, :H2].set(params["b2"]),
        "b3": jnp.zeros((1, Fp), jnp.float32).at[0, :F].set(params["b3"]),
    }


# --------------------------------------------------------------------------
# References for self-test
# --------------------------------------------------------------------------
def _reference_f32(x, m, params):
    x_cat = jnp.concatenate([x, m], axis=1)
    h1 = jnp.maximum(x_cat @ params["w1"] + params["b1"], 0.0)
    h2 = jnp.maximum(h1 @ params["w2"] + params["b2"], 0.0)
    gen = jax.nn.sigmoid(h2 @ params["w3"] + params["b3"])
    comb = x * m + gen * (1.0 - m)
    return gen, comb


def _reference_bf16_dots(x, m, params):
    """Mimics the kernel's bf16-input / f32-accumulate dots."""
    bf = jnp.bfloat16
    x_cat = jnp.concatenate([x, m], axis=1).astype(bf)
    h1 = jnp.maximum(jnp.dot(x_cat, params["w1"].astype(bf),
                             preferred_element_type=jnp.float32) + params["b1"], 0.0)
    h2 = jnp.maximum(jnp.dot(h1.astype(bf), params["w2"].astype(bf),
                             preferred_element_type=jnp.float32) + params["b2"], 0.0)
    gen = jax.nn.sigmoid(jnp.dot(h2.astype(bf), params["w3"].astype(bf),
                                 preferred_element_type=jnp.float32) + params["b3"])
    comb = x * m + gen * (1.0 - m)
    return gen, comb


if __name__ == "__main__":
    number_features = 16
    hidden_1 = 32
    hidden_2 = 32
    batch = 8

    key = jax.random.PRNGKey(0)
    kp, kx, km = jax.random.split(key, 3)

    params = init_params(kp, number_features, hidden_1, hidden_2)
    padded = pad_params(params)

    features_noise = jax.random.normal(kx, (batch, number_features), dtype=jnp.float32)
    missing_mask = (jax.random.uniform(km, (batch, number_features)) > 0.5).astype(jnp.float32)

    gen, comb = generator_forward(features_noise, missing_mask, padded)
    gen = jax.block_until_ready(gen)
    comb = jax.block_until_ready(comb)

    assert gen.shape == (batch, number_features)
    assert comb.shape == (batch, number_features)

    # Tight check vs. a reference that mimics the kernel's bf16 dots
    # (slack covers approx reciprocal + MXU accumulation-order differences).
    gen_b, comb_b = _reference_bf16_dots(features_noise, missing_mask, params)
    assert jnp.allclose(gen, gen_b, atol=5e-3, rtol=5e-3), "features_generated mismatch (bf16 ref)"
    assert jnp.allclose(comb, comb_b, atol=5e-3, rtol=5e-3), "features_combined mismatch (bf16 ref)"

    # Loose check vs. the pure-f32 module semantics (bf16 weight quantization).
    gen_f, comb_f = _reference_f32(features_noise, missing_mask, params)
    assert jnp.allclose(gen, gen_f, atol=3e-2, rtol=3e-2), "features_generated mismatch (f32 ref)"
    assert jnp.allclose(comb, comb_f, atol=3e-2, rtol=3e-2), "features_combined mismatch (f32 ref)"

    print("KERNEL_OK")
</pallas_src>

<mosaic_0001>
module attributes {stable_mosaic.version = 11 : i64} {
  func.func @_generator_kernel(%arg0: i32, %arg1: memref<8x128xf32, #tpu.memory_space<vmem>>, %arg2: memref<8x128xf32, #tpu.memory_space<vmem>>, %arg3: memref<256x128xbf16, #tpu.memory_space<vmem>>, %arg4: memref<1x128xf32, #tpu.memory_space<vmem>>, %arg5: memref<128x128xbf16, #tpu.memory_space<vmem>>, %arg6: memref<1x128xf32, #tpu.memory_space<vmem>>, %arg7: memref<128x128xbf16, #tpu.memory_space<vmem>>, %arg8: memref<1x128xf32, #tpu.memory_space<vmem>>, %arg9: memref<8x128xf32, #tpu.memory_space<vmem>>, %arg10: memref<8x128xf32, #tpu.memory_space<vmem>>) attributes {dimension_semantics = [#tpu.dimension_semantics<parallel>], iteration_bounds = array<i64: 1>, scalar_prefetch = 0 : i64, scratch_operands = 0 : i64, tpu.core_type = #tpu.core_type<tc>, window_params = [{transform_indices = @transform_0, window_bounds = array<i64: 8, 128>}, {transform_indices = @transform_1, window_bounds = array<i64: 8, 128>}, {pipeline_mode = #tpu.pipeline_mode<synchronous>, transform_indices = @transform_2, window_bounds = array<i64: 256, 128>}, {pipeline_mode = #tpu.pipeline_mode<synchronous>, transform_indices = @transform_3, window_bounds = array<i64: 1, 128>}, {pipeline_mode = #tpu.pipeline_mode<synchronous>, transform_indices = @transform_4, window_bounds = array<i64: 128, 128>}, {pipeline_mode = #tpu.pipeline_mode<synchronous>, transform_indices = @transform_5, window_bounds = array<i64: 1, 128>}, {pipeline_mode = #tpu.pipeline_mode<synchronous>, transform_indices = @transform_6, window_bounds = array<i64: 128, 128>}, {pipeline_mode = #tpu.pipeline_mode<synchronous>, transform_indices = @transform_7, window_bounds = array<i64: 1, 128>}, {transform_indices = @transform_8, window_bounds = array<i64: 8, 128>}, {transform_indices = @transform_9, window_bounds = array<i64: 8, 128>}]} {
    %c0 = arith.constant 0 : index
    %c0_0 = arith.constant 0 : index
    %0 = vector.load %arg1[%c0, %c0_0] : memref<8x128xf32, #tpu.memory_space<vmem>>, vector<8x128xf32>
    %c0_1 = arith.constant 0 : index
    %c0_2 = arith.constant 0 : index
    %1 = vector.load %arg2[%c0_1, %c0_2] : memref<8x128xf32, #tpu.memory_space<vmem>>, vector<8x128xf32>
    %2 = tpu.concatenate %0, %1 in 1 : vector<8x128xf32>, vector<8x128xf32> -> vector<8x256xf32>
    %3 = arith.truncf %2 : vector<8x256xf32> to vector<8x256xbf16>
    %c0_3 = arith.constant 0 : index
    %c0_4 = arith.constant 0 : index
    %4 = vector.load %arg3[%c0_3, %c0_4] : memref<256x128xbf16, #tpu.memory_space<vmem>>, vector<256x128xbf16>
    %cst = arith.constant dense<0.000000e+00> : vector<8x128xf32>
    %5 = tpu.matmul %3, %4, %cst {dimension_numbers = #tpu.dot_dimension_numbers<[1], [0], [0], [1], [0, 0, 1, 1], [], []>} : vector<8x256xbf16>, vector<256x128xbf16>, vector<8x128xf32> -> vector<8x128xf32>
    %c0_5 = arith.constant 0 : index
    %c0_6 = arith.constant 0 : index
    %6 = vector.load %arg4[%c0_5, %c0_6] : memref<1x128xf32, #tpu.memory_space<vmem>>, vector<1x128xf32>
    %7 = vector.broadcast %6 : vector<1x128xf32> to vector<8x128xf32>
    %8 = arith.addf %5, %7 : vector<8x128xf32>
    %cst_7 = arith.constant 0.000000e+00 : f32
    %9 = vector.broadcast %cst_7 : f32 to vector<8x128xf32>
    %10 = arith.maximumf %8, %9 : vector<8x128xf32>
    %11 = arith.truncf %10 : vector<8x128xf32> to vector<8x128xbf16>
    %c0_8 = arith.constant 0 : index
    %c0_9 = arith.constant 0 : index
    %12 = vector.load %arg5[%c0_8, %c0_9] : memref<128x128xbf16, #tpu.memory_space<vmem>>, vector<128x128xbf16>
    %cst_10 = arith.constant dense<0.000000e+00> : vector<8x128xf32>
    %13 = tpu.matmul %11, %12, %cst_10 {dimension_numbers = #tpu.dot_dimension_numbers<[1], [0], [0], [1], [0, 0, 1, 1], [], []>} : vector<8x128xbf16>, vector<128x128xbf16>, vector<8x128xf32> -> vector<8x128xf32>
    %c0_11 = arith.constant 0 : index
    %c0_12 = arith.constant 0 : index
    %14 = vector.load %arg6[%c0_11, %c0_12] : memref<1x128xf32, #tpu.memory_space<vmem>>, vector<1x128xf32>
    %15 = vector.broadcast %14 : vector<1x128xf32> to vector<8x128xf32>
    %16 = arith.addf %13, %15 : vector<8x128xf32>
    %cst_13 = arith.constant 0.000000e+00 : f32
    %17 = vector.broadcast %cst_13 : f32 to vector<8x128xf32>
    %18 = arith.maximumf %16, %17 : vector<8x128xf32>
    %19 = arith.truncf %18 : vector<8x128xf32> to vector<8x128xbf16>
    %c0_14 = arith.constant 0 : index
    %c0_15 = arith.constant 0 : index
    %20 = vector.load %arg7[%c0_14, %c0_15] : memref<128x128xbf16, #tpu.memory_space<vmem>>, vector<128x128xbf16>
    %cst_16 = arith.constant dense<0.000000e+00> : vector<8x128xf32>
    %21 = tpu.matmul %19, %20, %cst_16 {dimension_numbers = #tpu.dot_dimension_numbers<[1], [0], [0], [1], [0, 0, 1, 1], [], []>} : vector<8x128xbf16>, vector<128x128xbf16>, vector<8x128xf32> -> vector<8x128xf32>
    %c0_17 = arith.constant 0 : index
    %c0_18 = arith.constant 0 : index
    %22 = vector.load %arg8[%c0_17, %c0_18] : memref<1x128xf32, #tpu.memory_space<vmem>>, vector<1x128xf32>
    %23 = vector.broadcast %22 : vector<1x128xf32> to vector<8x128xf32>
    %24 = arith.addf %21, %23 : vector<8x128xf32>
    %cst_19 = arith.constant 0.000000e+00 : f32
    %25 = vector.broadcast %cst_19 : f32 to vector<8x128xf32>
    %26 = arith.subf %25, %24 : vector<8x128xf32>
    %27 = math.exp %26 : vector<8x128xf32>
    %cst_20 = arith.constant 1.000000e+00 : f32
    %28 = vector.broadcast %cst_20 : f32 to vector<8x128xf32>
    %29 = arith.addf %28, %27 : vector<8x128xf32>
    %30 = tpu.reciprocal %29 {approx = true} : vector<8x128xf32> -> vector<8x128xf32>
    %c0_21 = arith.constant 0 : index
    %c0_22 = arith.constant 0 : index
    %31 = vector.load %arg9[%c0_21, %c0_22] : memref<8x128xf32, #tpu.memory_space<vmem>>, vector<8x128xf32>
    tpu.vector_store %arg9[%c0_21, %c0_22], %30 {strides = array<i32>} : memref<8x128xf32, #tpu.memory_space<vmem>>, vector<8x128xf32>,
    %32 = arith.subf %0, %30 : vector<8x128xf32>
    %33 = arith.mulf %1, %32 : vector<8x128xf32>
    %34 = arith.addf %30, %33 : vector<8x128xf32>
    %c0_23 = arith.constant 0 : index
    %c0_24 = arith.constant 0 : index
    %35 = vector.load %arg10[%c0_23, %c0_24] : memref<8x128xf32, #tpu.memory_space<vmem>>, vector<8x128xf32>
    tpu.vector_store %arg10[%c0_23, %c0_24], %34 {strides = array<i32>} : memref<8x128xf32, #tpu.memory_space<vmem>>, vector<8x128xf32>,
    return
  }
  func.func @transform_0(%arg0: i32) -> (i32, i32) {
    %c0_i32 = arith.constant 0 : i32
    %c0_i32_0 = arith.constant 0 : i32
    return %arg0, %c0_i32 : i32, i32
  }
  func.func @transform_1(%arg0: i32) -> (i32, i32) {
    %c0_i32 = arith.constant 0 : i32
    %c0_i32_0 = arith.constant 0 : i32
    return %arg0, %c0_i32 : i32, i32
  }
  func.func @transform_2(%arg0: i32) -> (i32, i32) {
    %c0_i32 = arith.constant 0 : i32
    %c0_i32_0 = arith.constant 0 : i32
    %c0_i32_1 = arith.constant 0 : i32
    return %c0_i32, %c0_i32_0 : i32, i32
  }
  func.func @transform_3(%arg0: i32) -> (i32, i32) {
    %c0_i32 = arith.constant 0 : i32
    %c0_i32_0 = arith.constant 0 : i32
    %c0_i32_1 = arith.constant 0 : i32
    return %c0_i32, %c0_i32_0 : i32, i32
  }
  func.func @transform_4(%arg0: i32) -> (i32, i32) {
    %c0_i32 = arith.constant 0 : i32
    %c0_i32_0 = arith.constant 0 : i32
    %c0_i32_1 = arith.constant 0 : i32
    return %c0_i32, %c0_i32_0 : i32, i32
  }
  func.func @transform_5(%arg0: i32) -> (i32, i32) {
    %c0_i32 = arith.constant 0 : i32
    %c0_i32_0 = arith.constant 0 : i32
    %c0_i32_1 = arith.constant 0 : i32
    return %c0_i32, %c0_i32_0 : i32, i32
  }
  func.func @transform_6(%arg0: i32) -> (i32, i32) {
    %c0_i32 = arith.constant 0 : i32
    %c0_i32_0 = arith.constant 0 : i32
    %c0_i32_1 = arith.constant 0 : i32
    return %c0_i32, %c0_i32_0 : i32, i32
  }
  func.func @transform_7(%arg0: i32) -> (i32, i32) {
    %c0_i32 = arith.constant 0 : i32
    %c0_i32_0 = arith.constant 0 : i32
    %c0_i32_1 = arith.constant 0 : i32
    return %c0_i32, %c0_i32_0 : i32, i32
  }
  func.func @transform_8(%arg0: i32) -> (i32, i32) {
    %c0_i32 = arith.constant 0 : i32
    %c0_i32_0 = arith.constant 0 : i32
    return %arg0, %c0_i32 : i32, i32
  }
  func.func @transform_9(%arg0: i32) -> (i32, i32) {
    %c0_i32 = arith.constant 0 : i32
    %c0_i32_0 = arith.constant 0 : i32
    return %arg0, %c0_i32 : i32, i32
  }
}

module attributes {stable_mosaic.version = 11 : i64} {
  func.func @_generator_kernel(%arg0: i32, %arg1: memref<8x128xf32, #tpu.memory_space<vmem>>, %arg2: memref<8x128xf32, #tpu.memory_space<vmem>>, %arg3: memref<256x128xbf16, #tpu.memory_space<vmem>>, %arg4: memref<1x128xf32, #tpu.memory_space<vmem>>, %arg5: memref<128x128xbf16, #tpu.memory_space<vmem>>, %arg6: memref<1x128xf32, #tpu.memory_space<vmem>>, %arg7: memref<128x128xbf16, #tpu.memory_space<vmem>>, %arg8: memref<1x128xf32, #tpu.memory_space<vmem>>, %arg9: memref<8x128xf32, #tpu.memory_space<vmem>>, %arg10: memref<8x128xf32, #tpu.memory_space<vmem>>) attributes {dimension_semantics = [#tpu.dimension_semantics<parallel>], iteration_bounds = array<i64: 1>, scalar_prefetch = 0 : i64, scratch_operands = 0 : i64, tpu.core_type = #tpu.core_type<tc>, window_params = [{transform_indices = @transform_0, window_bounds = array<i64: 8, 128>}, {transform_indices = @transform_1, window_bounds = array<i64: 8, 128>}, {pipeline_mode = #tpu.pipeline_mode<synchronous>, transform_indices = @transform_2, window_bounds = array<i64: 256, 128>}, {pipeline_mode = #tpu.pipeline_mode<synchronous>, transform_indices = @transform_3, window_bounds = array<i64: 1, 128>}, {pipeline_mode = #tpu.pipeline_mode<synchronous>, transform_indices = @transform_4, window_bounds = array<i64: 128, 128>}, {pipeline_mode = #tpu.pipeline_mode<synchronous>, transform_indices = @transform_5, window_bounds = array<i64: 1, 128>}, {pipeline_mode = #tpu.pipeline_mode<synchronous>, transform_indices = @transform_6, window_bounds = array<i64: 128, 128>}, {pipeline_mode = #tpu.pipeline_mode<synchronous>, transform_indices = @transform_7, window_bounds = array<i64: 1, 128>}, {transform_indices = @transform_8, window_bounds = array<i64: 8, 128>}, {transform_indices = @transform_9, window_bounds = array<i64: 8, 128>}]} {
    %c0 = arith.constant 0 : index
    %c0_0 = arith.constant 0 : index
    %0 = vector.load %arg1[%c0, %c0_0] : memref<8x128xf32, #tpu.memory_space<vmem>>, vector<8x128xf32>
    %c0_1 = arith.constant 0 : index
    %c0_2 = arith.constant 0 : index
    %1 = vector.load %arg2[%c0_1, %c0_2] : memref<8x128xf32, #tpu.memory_space<vmem>>, vector<8x128xf32>
    %2 = tpu.concatenate %0, %1 in 1 : vector<8x128xf32>, vector<8x128xf32> -> vector<8x256xf32>
    %3 = arith.truncf %2 : vector<8x256xf32> to vector<8x256xbf16>
    %c0_3 = arith.constant 0 : index
    %c0_4 = arith.constant 0 : index
    %4 = vector.load %arg3[%c0_3, %c0_4] : memref<256x128xbf16, #tpu.memory_space<vmem>>, vector<256x128xbf16>
    %cst = arith.constant dense<0.000000e+00> : vector<8x128xf32>
    %5 = tpu.matmul %3, %4, %cst {dimension_numbers = #tpu.dot_dimension_numbers<[1], [0], [0], [1], [0, 0, 1, 1], [], []>} : vector<8x256xbf16>, vector<256x128xbf16>, vector<8x128xf32> -> vector<8x128xf32>
    %c0_5 = arith.constant 0 : index
    %c0_6 = arith.constant 0 : index
    %6 = vector.load %arg4[%c0_5, %c0_6] : memref<1x128xf32, #tpu.memory_space<vmem>>, vector<1x128xf32>
    %7 = vector.broadcast %6 : vector<1x128xf32> to vector<8x128xf32>
    %8 = arith.addf %5, %7 : vector<8x128xf32>
    %cst_7 = arith.constant 0.000000e+00 : f32
    %9 = vector.broadcast %cst_7 : f32 to vector<8x128xf32>
    %10 = arith.maximumf %8, %9 : vector<8x128xf32>
    %11 = arith.truncf %10 : vector<8x128xf32> to vector<8x128xbf16>
    %c0_8 = arith.constant 0 : index
    %c0_9 = arith.constant 0 : index
    %12 = vector.load %arg5[%c0_8, %c0_9] : memref<128x128xbf16, #tpu.memory_space<vmem>>, vector<128x128xbf16>
    %cst_10 = arith.constant dense<0.000000e+00> : vector<8x128xf32>
    %13 = tpu.matmul %11, %12, %cst_10 {dimension_numbers = #tpu.dot_dimension_numbers<[1], [0], [0], [1], [0, 0, 1, 1], [], []>} : vector<8x128xbf16>, vector<128x128xbf16>, vector<8x128xf32> -> vector<8x128xf32>
    %c0_11 = arith.constant 0 : index
    %c0_12 = arith.constant 0 : index
    %14 = vector.load %arg6[%c0_11, %c0_12] : memref<1x128xf32, #tpu.memory_space<vmem>>, vector<1x128xf32>
    %15 = vector.broadcast %14 : vector<1x128xf32> to vector<8x128xf32>
    %16 = arith.addf %13, %15 : vector<8x128xf32>
    %cst_13 = arith.constant 0.000000e+00 : f32
    %17 = vector.broadcast %cst_13 : f32 to vector<8x128xf32>
    %18 = arith.maximumf %16, %17 : vector<8x128xf32>
    %19 = arith.truncf %18 : vector<8x128xf32> to vector<8x128xbf16>
    %c0_14 = arith.constant 0 : index
    %c0_15 = arith.constant 0 : index
    %20 = vector.load %arg7[%c0_14, %c0_15] : memref<128x128xbf16, #tpu.memory_space<vmem>>, vector<128x128xbf16>
    %cst_16 = arith.constant dense<0.000000e+00> : vector<8x128xf32>
    %21 = tpu.matmul %19, %20, %cst_16 {dimension_numbers = #tpu.dot_dimension_numbers<[1], [0], [0], [1], [0, 0, 1, 1], [], []>} : vector<8x128xbf16>, vector<128x128xbf16>, vector<8x128xf32> -> vector<8x128xf32>
    %c0_17 = arith.constant 0 : index
    %c0_18 = arith.constant 0 : index
    %22 = vector.load %arg8[%c0_17, %c0_18] : memref<1x128xf32, #tpu.memory_space<vmem>>, vector<1x128xf32>
    %23 = vector.broadcast %22 : vector<1x128xf32> to vector<8x128xf32>
    %24 = arith.addf %21, %23 : vector<8x128xf32>
    %cst_19 = arith.constant 0.000000e+00 : f32
    %25 = vector.broadcast %cst_19 : f32 to vector<8x128xf32>
    %26 = arith.subf %25, %24 : vector<8x128xf32>
    %27 = math.exp %26 : vector<8x128xf32>
    %cst_20 = arith.constant 1.000000e+00 : f32
    %28 = vector.broadcast %cst_20 : f32 to vector<8x128xf32>
    %29 = arith.addf %28, %27 : vector<8x128xf32>
    %30 = tpu.reciprocal %29 {approx = true} : vector<8x128xf32> -> vector<8x128xf32>
    %c0_21 = arith.constant 0 : index
    %c0_22 = arith.constant 0 : index
    %31 = vector.load %arg9[%c0_21, %c0_22] : memref<8x128xf32, #tpu.memory_space<vmem>>, vector<8x128xf32>
    tpu.vector_store %arg9[%c0_21, %c0_22], %30 {strides = array<i32>} : memref<8x128xf32, #tpu.memory_space<vmem>>, vector<8x128xf32>,
    %32 = arith.subf %0, %30 : vector<8x128xf32>
    %33 = arith.mulf %1, %32 : vector<8x128xf32>
    %34 = arith.addf %30, %33 : vector<8x128xf32>
    %c0_23 = arith.constant 0 : index
    %c0_24 = arith.constant 0 : index
    %35 = vector.load %arg10[%c0_23, %c0_24] : memref<8x128xf32, #tpu.memory_space<vmem>>, vector<8x128xf32>
    tpu.vector_store %arg10[%c0_23, %c0_24], %34 {strides = array<i32>} : memref<8x128xf32, #tpu.memory_space<vmem>>, vector<8x128xf32>,
    return
  }
  func.func @transform_0(%arg0: i32) -> (i32, i32) {
    %c0_i32 = arith.constant 0 : i32
    %c0_i32_0 = arith.constant 0 : i32
    return %arg0, %c0_i32 : i32, i32
  }
  func.func @transform_1(%arg0: i32) -> (i32, i32) {
    %c0_i32 = arith.constant 0 : i32
    %c0_i32_0 = arith.constant 0 : i32
    return %arg0, %c0_i32 : i32, i32
  }
  func.func @transform_2(%arg0: i32) -> (i32, i32) {
    %c0_i32 = arith.constant 0 : i32
    %c0_i32_0 = arith.constant 0 : i32
    %c0_i32_1 = arith.constant 0 : i32
    return %c0_i32, %c0_i32_0 : i32, i32
  }
  func.func @transform_3(%arg0: i32) -> (i32, i32) {
    %c0_i32 = arith.constant 0 : i32
    %c0_i32_0 = arith.constant 0 : i32
    %c0_i32_1 = arith.constant 0 : i32
    return %c0_i32, %c0_i32_0 : i32, i32
  }
  func.func @transform_4(%arg0: i32) -> (i32, i32) {
    %c0_i32 = arith.constant 0 : i32
    %c0_i32_0 = arith.constant 0 : i32
    %c0_i32_1 = arith.constant 0 : i32
    return %c0_i32, %c0_i32_0 : i32, i32
  }
  func.func @transform_5(%arg0: i32) -> (i32, i32) {
    %c0_i32 = arith.constant 0 : i32
    %c0_i32_0 = arith.constant 0 : i32
    %c0_i32_1 = arith.constant 0 : i32
    return %c0_i32, %c0_i32_0 : i32, i32
  }
  func.func @transform_6(%arg0: i32) -> (i32, i32) {
    %c0_i32 = arith.constant 0 : i32
    %c0_i32_0 = arith.constant 0 : i32
    %c0_i32_1 = arith.constant 0 : i32
    return %c0_i32, %c0_i32_0 : i32, i32
  }
  func.func @transform_7(%arg0: i32) -> (i32, i32) {
    %c0_i32 = arith.constant 0 : i32
    %c0_i32_0 = arith.constant 0 : i32
    %c0_i32_1 = arith.constant 0 : i32
    return %c0_i32, %c0_i32_0 : i32, i32
  }
  func.func @transform_8(%arg0: i32) -> (i32, i32) {
    %c0_i32 = arith.constant 0 : i32
    %c0_i32_0 = arith.constant 0 : i32
    return %arg0, %c0_i32 : i32, i32
  }
  func.func @transform_9(%arg0: i32) -> (i32, i32) {
    %c0_i32 = arith.constant 0 : i32
    %c0_i32_0 = arith.constant 0 : i32
    return %arg0, %c0_i32 : i32, i32
  }
}

</mosaic_0001>

<bundles_post_ra>
// kernel: _forward_impl.1
= control target key start
LH: loop header
LB: loop body
LE: loop exit
PB: predicated region body
PF: predicated region fallthrough
CT: control target
= control target key end

     0   :  { %15 = vsyncpa [#allocation3], 0  ;;  %s851_s0 = inlined_call_operand.vmem [shape: f32[8,128], index: 0, kind: input, shape index: {}]   ;;  %s852_s1 = inlined_call_operand.vmem [shape: f32[8,128], index: 1, kind: input, shape index: {}]   ;;  %s853_s2 = inlined_call_operand.hbm [shape: bf16[256,128], index: 2, kind: input, shape index: {}]   ;;  %s854_s3 = inlined_call_operand.vmem [shape: f32[1,128], index: 3, kind: input, shape index: {}]   ;;  %s855_s4 = inlined_call_operand.hbm [shape: bf16[128,128], index: 4, kind: input, shape index: {}]   ;;  %s856_s5 = inlined_call_operand.vmem [shape: f32[1,128], index: 5, kind: input, shape index: {}]   ;;  %s857_s6 = inlined_call_operand.hbm [shape: bf16[128,128], index: 6, kind: input, shape index: {}]   ;;  %s858_s7 = inlined_call_operand.vmem [shape: f32[1,128], index: 7, kind: input, shape index: {}]   ;;  %s859_s8 = inlined_call_operand.hbm [shape: f32[8,128], index: 8, kind: output, shape index: {0}]   ;;  %s860_s9 = inlined_call_operand.hbm [shape: f32[8,128], index: 9, kind: output, shape index: {1}]  }
   0x1   :  { %16 = vsyncpa [#allocation6], 0 }
   0x2   :  { %17 = vsyncpa [#allocation4], 0 }
   0x3   :  { %18 = vsyncpa [#allocation10], 0  ;;  %s42_s11 = sshll.u32 %s855_s4, 4  ;;  %s754_s12 = smov [#allocation5]   ;;  %s43_s11 = int_to_ptr.hbm [resolvable:$true] %s42_s11 }
   0x4   :  { %s44_s13 = sshll.u32 %s754_s12, 4  ;;  %s27_s16 = sshll.u32 %s853_s2, 4  ;;  %s45_s13 = int_to_ptr.vmem [resolvable:$true] %s44_s13  ;;  %s28_s16 = int_to_ptr.hbm [resolvable:$true] %s27_s16 }
   0x5   :  { %s755_s17 = smov 64   ;;  %s756_s18 = smov 4  }
   0x6   :  { %50 = dma.hbm_to_vmem [thread:$0]  %s43_s11, 1024, %s45_s13, [#allocation6], %s755_s17, %s755_s17, %s756_s18  }
   0x7   :  { %s757_s19 = smov [#allocation2]   ;;  %s57_s23 = sshll.u32 %s857_s6, 4  ;;  %s58_s23 = int_to_ptr.hbm [resolvable:$true] %s57_s23 }
   0x8   :  { %s29_s20 = sshll.u32 %s757_s19, 4  ;;  %s758_s4 = smov [#allocation7]   ;;  %s30_s20 = int_to_ptr.vmem [resolvable:$true] %s29_s20 }
   0x9   :  { %35 = dma.hbm_to_vmem [thread:$0]  %s28_s16, 2048, %s30_s20, [#allocation3], %s755_s17, %s755_s17, %s756_s18  }
   0xa   :  { %s59_s24 = sshll.u32 %s758_s4, 4  ;;  %s60_s24 = int_to_ptr.vmem [resolvable:$true] %s59_s24 }
   0xb   :  { %65 = dma.hbm_to_vmem [thread:$0]  %s58_s23, 1024, %s60_s24, [#allocation6], %s755_s17, %s755_s17, %s756_s18  }
   0xc   :  { %746 = dma.done.wait [#allocation3], 2048  }
   0xd   :  { %747 = vsyncadd [#allocation3], 4294965248 }
   0xe   :  { %748 = dma.done.wait [#allocation6], 2048  }
   0xf   :  { %749 = vsyncadd [#allocation6], 4294965248  ;;  %v587_v0 = vld [vmem:[#allocation2 + $0x38] sm:$0xff]  ;;  %v586_v2 = vld [vmem:[#allocation2 + $0x30] sm:$0xff]  ;;  %s425_s12 = sshll.u32 %s859_s8, 4  ;;  %s436_s16 = sshll.u32 %s860_s9, 4  ;;  %s426_s12 = int_to_ptr.hbm [resolvable:$true] %s425_s12  ;;  %s437_s16 = int_to_ptr.hbm [resolvable:$true] %s436_s16 }
  0x10   :  { %v595_v1 = vld [vmem:[#allocation2 + $0x78] sm:$0xff]  ;;  %216 = vmatpush.bf16.msra.mxu0 %v587_v0  ;;  %v594_v3 = vld [vmem:[#allocation2 + $0x70] sm:$0xff]  ;;  %v585_v4 = vld [vmem:[#allocation2 + $0x28] sm:$0xff] }
  0x11   :  { %229 = vmatpush.bf16.msra.mxu1 %v595_v1  ;;  %v593_v5 = vld [vmem:[#allocation2 + $0x68] sm:$0xff]  ;;  %v603_v6 = vld [vmem:[#allocation5 + $0x38] sm:$0xff]  ;;  %v602_v7 = vld [vmem:[#allocation5 + $0x30] sm:$0xff] }
  0x12   :  { %312 = vmatpush.bf16.msra.mxu2 %v603_v6  ;;  %v584_v8 = vld [vmem:[#allocation2 + $0x20] sm:$0xff]  ;;  %v601_v10 = vld [vmem:[#allocation5 + $0x28] sm:$0xff]  ;;  %v583_v11 = vld [vmem:[#allocation2 + $0x18] sm:$0xff] }
  0x13   :  { %v592_v9 = vld [vmem:[#allocation2 + $0x60] sm:$0xff]  ;;  %v591_v12 = vld [vmem:[#allocation2 + $0x58] sm:$0xff]  ;;  %v582_v14 = vld [vmem:[#allocation2 + $0x10] sm:$0xff] }
  0x14   :  { %217 = vmatpush.bf16.msra.mxu0 %v586_v2  ;;  %v600_v13 = vld [vmem:[#allocation5 + $0x20] sm:$0xff]  ;;  %v590_v15 = vld [vmem:[#allocation2 + $0x50] sm:$0xff]  ;;  %v599_v16 = vld [vmem:[#allocation5 + $0x18] sm:$0xff] }
  0x15   :  { %230 = vmatpush.bf16.msra.mxu1 %v594_v3  ;;  %v581_v17 = vld [vmem:[#allocation2 + $0x8] sm:$0xff]  ;;  %v598_v19 = vld [vmem:[#allocation5 + $0x10] sm:$0xff]  ;;  %v580_v20 = vld [vmem:[#allocation2] sm:$0xff] }
  0x16   :  { %313 = vmatpush.bf16.msra.mxu2 %v602_v7  ;;  %v589_v18 = vld [vmem:[#allocation2 + $0x48] sm:$0xff]  ;;  %v588_v21 = vld [vmem:[#allocation2 + $0x40] sm:$0xff]  ;;  %v611_v28 = vld [vmem:[#allocation7 + $0x38] sm:$0xff] }
  0x17   :  { %v823_v22 = vld [vmem:[%s851_s0] sm:$0xff]  ;;  %v597_v26 = vld [vmem:[#allocation5 + $0x8] sm:$0xff]  ;;  %395 = vmatpush.bf16.msra.mxu3 %v611_v28  ;;  %v610_v29 = vld [vmem:[#allocation7 + $0x30] sm:$0xff] }
  0x18   :  { %218 = vmatpush.bf16.msra.mxu0 %v585_v4  ;;  %v828_v23 = vld [vmem:[%s852_s1] sm:$0xff]  ;;  %v82_v24 = vpack.c.bf16 %v823_v22, %v823_v22  ;;  %v609_v30 = vld [vmem:[#allocation7 + $0x28] sm:$0xff]  ;;  %v607_v32 = vld [vmem:[#allocation7 + $0x18] sm:$0xff] }
  0x19   :  { %231 = vmatpush.bf16.msra.mxu1 %v593_v5  ;;  %v83_v25 = vpack.c.bf16 %v828_v23, %v828_v23  ;;  %v596_v27 = vld [vmem:[#allocation5] sm:$0xff]  ;;  %v606_v33 = vld [vmem:[#allocation7 + $0x10] sm:$0xff]  ;;  %v605_v43 = vld [vmem:[#allocation7 + $0x8] sm:$0xff] }
  0x1a   :  { %314 = vmatpush.bf16.msra.mxu2 %v601_v10  ;;  %v608_v31 = vld [vmem:[#allocation7 + $0x20] sm:$0xff] }
  0x1b   :  { %396 = vmatpush.bf16.msra.mxu3 %v610_v29  ;;  %v619_v34 = vld [vmem:[%s854_s3] ss:$0 sm:$0xff] }
  0x1c   :  { %219 = vmatpush.bf16.msra.mxu0 %v584_v8  ;;  %v604_v44 = vld [vmem:[#allocation7] sm:$0xff] }
  0x1d   :  { %232 = vmatpush.bf16.msra.mxu1 %v592_v9  ;;  %v620_v45 = vld [vmem:[%s856_s5] ss:$0 sm:$0xff]  ;;  %s759_s5 = smov [#allocation8]  }
  0x1e   :  { %315 = vmatpush.bf16.msra.mxu2 %v600_v13  ;;  %v621_v51 = vld [vmem:[%s858_s7] ss:$0 sm:$0xff]  ;;  %s423_s30 = sshll.u32 %s759_s5, 4  ;;  %s760_s7 = smov [#allocation9]   ;;  %s424_s30 = int_to_ptr.vmem [resolvable:$true] %s423_s30 }
  0x1f   :  { %397 = vmatpush.bf16.msra.mxu3 %v609_v30  ;;  %s434_s13 = sshll.u32 %s760_s7, 4  ;;  %s435_s13 = int_to_ptr.vmem [resolvable:$true] %s434_s13 }
  0x20   :  { %220 = vmatpush.bf16.msra.mxu0 %v583_v11 }
  0x21   :  { %233 = vmatpush.bf16.msra.mxu1 %v591_v12 }
  0x22   :  { %316 = vmatpush.bf16.msra.mxu2 %v599_v16 }
  0x23   :  { %398 = vmatpush.bf16.msra.mxu3 %v608_v31 }
  0x24   :  { %221 = vmatpush.bf16.msra.mxu0 %v582_v14 }
  0x25   :  { %234 = vmatpush.bf16.msra.mxu1 %v590_v15 }
  0x26   :  { %317 = vmatpush.bf16.msra.mxu2 %v598_v19 }
  0x27   :  { %399 = vmatpush.bf16.msra.mxu3 %v607_v32 }
  0x28   :  { %222 = vmatpush.bf16.msra.mxu0 %v581_v17 }
  0x29   :  { %235 = vmatpush.bf16.msra.mxu1 %v589_v18 }
  0x2a   :  { %318 = vmatpush.bf16.msra.mxu2 %v597_v26 }
  0x2b   :  { %400 = vmatpush.bf16.msra.mxu3 %v606_v33 }
  0x2c   :  { %223 = vmatpush.bf16.msra.mxu0 %v580_v20 }
  0x2d   :  { %236 = vmatpush.bf16.msra.mxu1 %v588_v21 }
  0x2e   :  { %319 = vmatpush.bf16.msra.mxu2 %v596_v27 }
  0x2f   :  { %224 = vmatmul.bf16.vlgmr.msra.gmra.mxu0 %v82_v24  ;;  %401 = vmatpush.bf16.msra.mxu3 %v605_v43 }
  0x30   :  { %237 = vmatmul.bf16.vlgmr.msra.gmra.mxu1 %v83_v25 }
  0x33   :  { %402 = vmatpush.bf16.msra.mxu3 %v604_v44 }
  0xac   :  { %v225_v35 = vpop.f32.mrf.mxu0 }
  0xad   :  { %v238_v36 = vpop.f32.mrf.mxu1  ;;  %v226_v37 = vadd.f32 %v619_v34, %v225_v35 }
  0xaf   :  { %v239_v38 = vadd.f32 %v238_v36, %v226_v37 }
  0xb1   :  { %v242_v39 = vmax.f32 %v239_v38, 0.0 }
  0xb3   :  { %v243_v40 = vpack.c.bf16 %v242_v39, %v242_v39 }
  0xb4   :  { %v227_v41 = vpop.f32.mrf.mxu0 }
  0xb5   :  { %v240_v42 = vpop.f32.mrf.mxu1  ;;  %320 = vmatmul.bf16.vlgmr.msra.gmra.mxu2 %v243_v40 }
 0x138   :  { %v321_v46 = vpop.f32.mrf.mxu2 }
 0x139   :  { %v322_v47 = vadd.f32 %v620_v45, %v321_v46 }
 0x13b   :  { %v325_v48 = vmax.f32 %v322_v47, 0.0 }
 0x13d   :  { %v326_v49 = vpack.c.bf16 %v325_v48, %v325_v48 }
 0x13f   :  { %403 = vmatmul.bf16.vlgmr.msra.gmra.mxu3 %v326_v49 }
 0x140   :  { %v323_v50 = vpop.f32.mrf.mxu2 }
 0x1c2   :  { %v404_v52 = vpop.f32.mrf.mxu3 }
 0x1c3   :  { %v405_v53 = vadd.f32 %v621_v51, %v404_v52 }
 0x1c5   :  { %v408_v54 = vsub.f32 0.0, %v405_v53 }
 0x1c7   :  { %v409_v55 = vmul.f32 1.442695, %v408_v54 }
 0x1c9   :  { %622 = vpow2.f32 %v409_v55 }
 0x1ca   :  { %v406_v56 = vpop.f32.mrf.mxu3 }
 0x1cf   :  { %v623_v57 = vpop.eup %622 }
 0x1d0   :  { %v411_v58 = vadd.f32 1.0, %v623_v57 }
 0x1d2   :  { %624 = vrcp.f32 %v411_v58 }
 0x1d8   :  { %v625_v59 = vpop.eup %624 }
 0x1d9   :  { %413 = vst [vmem:[#allocation8] sm:$0xff] %v625_v59  ;;  %v414_v60 = vsub.f32 %v823_v22, %v625_v59 }
 0x1da   :  { %428 = dma.vmem_to_hbm [thread:$0]  %s424_s30, 128, %s426_s12, [#allocation4]  }
 0x1db   :  { %v415_v61 = vmul.f32 %v414_v60, %v828_v23 }
 0x1dd   :  { %v416_v62 = vadd.f32 %v625_v59, %v415_v61 }
 0x1df   :  { %417 = vst [vmem:[#allocation9] sm:$0xff] %v416_v62 }
 0x1e0   :  { %439 = dma.vmem_to_hbm [thread:$0]  %s435_s13, 128, %s437_s16, [#allocation10]  }
 0x1e1   :  { %750 = dma.done.wait [#allocation4], 128  }
 0x1e2   :  { %751 = vsyncadd [#allocation4], 4294967168 }
 0x1e3   :  { %752 = dma.done.wait [#allocation10], 128  }
 0x1e4   :  { %753 = vsyncadd [#allocation10], 4294967168 }
 0x1e5   :  { %448 = vsyncpa [#allocation3], 1 }
 0x1e6   :  { %449 = vsyncpa [#allocation6], 1 }
 0x1e7   :  { %450 = vsyncpa [#allocation4], 1 }
 0x1e8   :  { %451 = vsyncpa [#allocation10], 1 }

// kernel: _forward_impl.1
= control target key start
LH: loop header
LB: loop body
LE: loop exit
PB: predicated region body
PF: predicated region fallthrough
CT: control target
= control target key end

     0   :  { %15 = vsyncpa [#allocation3], 0  ;;  %s851_s0 = inlined_call_operand.vmem [shape: f32[8,128], index: 0, kind: input, shape index: {}]   ;;  %s852_s1 = inlined_call_operand.vmem [shape: f32[8,128], index: 1, kind: input, shape index: {}]   ;;  %s853_s2 = inlined_call_operand.hbm [shape: bf16[256,128], index: 2, kind: input, shape index: {}]   ;;  %s854_s3 = inlined_call_operand.vmem [shape: f32[1,128], index: 3, kind: input, shape index: {}]   ;;  %s855_s4 = inlined_call_operand.hbm [shape: bf16[128,128], index: 4, kind: input, shape index: {}]   ;;  %s856_s5 = inlined_call_operand.vmem [shape: f32[1,128], index: 5, kind: input, shape index: {}]   ;;  %s857_s6 = inlined_call_operand.hbm [shape: bf16[128,128], index: 6, kind: input, shape index: {}]   ;;  %s858_s7 = inlined_call_operand.vmem [shape: f32[1,128], index: 7, kind: input, shape index: {}]   ;;  %s859_s8 = inlined_call_operand.hbm [shape: f32[8,128], index: 8, kind: output, shape index: {0}]   ;;  %s860_s9 = inlined_call_operand.hbm [shape: f32[8,128], index: 9, kind: output, shape index: {1}]  }
   0x1   :  { %16 = vsyncpa [#allocation6], 0 }
   0x2   :  { %17 = vsyncpa [#allocation4], 0 }
   0x3   :  { %18 = vsyncpa [#allocation10], 0  ;;  %s42_s11 = sshll.u32 %s855_s4, 4  ;;  %s754_s12 = smov [#allocation5]   ;;  %s43_s11 = int_to_ptr.hbm [resolvable:$true] %s42_s11 }
   0x4   :  { %s44_s13 = sshll.u32 %s754_s12, 4  ;;  %s27_s16 = sshll.u32 %s853_s2, 4  ;;  %s45_s13 = int_to_ptr.vmem [resolvable:$true] %s44_s13  ;;  %s28_s16 = int_to_ptr.hbm [resolvable:$true] %s27_s16 }
   0x5   :  { %s755_s17 = smov 64   ;;  %s756_s18 = smov 4  }
   0x6   :  { %50 = dma.hbm_to_vmem [thread:$0]  %s43_s11, 1024, %s45_s13, [#allocation6], %s755_s17, %s755_s17, %s756_s18  }
   0x7   :  { %s757_s19 = smov [#allocation2]   ;;  %s57_s23 = sshll.u32 %s857_s6, 4  ;;  %s58_s23 = int_to_ptr.hbm [resolvable:$true] %s57_s23 }
   0x8   :  { %s29_s20 = sshll.u32 %s757_s19, 4  ;;  %s758_s4 = smov [#allocation7]   ;;  %s30_s20 = int_to_ptr.vmem [resolvable:$true] %s29_s20 }
   0x9   :  { %35 = dma.hbm_to_vmem [thread:$0]  %s28_s16, 2048, %s30_s20, [#allocation3], %s755_s17, %s755_s17, %s756_s18  }
   0xa   :  { %s59_s24 = sshll.u32 %s758_s4, 4  ;;  %s60_s24 = int_to_ptr.vmem [resolvable:$true] %s59_s24 }
   0xb   :  { %65 = dma.hbm_to_vmem [thread:$0]  %s58_s23, 1024, %s60_s24, [#allocation6], %s755_s17, %s755_s17, %s756_s18  }
   0xc   :  { %746 = dma.done.wait [#allocation3], 2048  }
   0xd   :  { %747 = vsyncadd [#allocation3], 4294965248 }
   0xe   :  { %748 = dma.done.wait [#allocation6], 2048  }
   0xf   :  { %749 = vsyncadd [#allocation6], 4294965248  ;;  %v587_v0 = vld [vmem:[#allocation2 + $0x38] sm:$0xff]  ;;  %v586_v2 = vld [vmem:[#allocation2 + $0x30] sm:$0xff]  ;;  %s425_s12 = sshll.u32 %s859_s8, 4  ;;  %s436_s16 = sshll.u32 %s860_s9, 4  ;;  %s426_s12 = int_to_ptr.hbm [resolvable:$true] %s425_s12  ;;  %s437_s16 = int_to_ptr.hbm [resolvable:$true] %s436_s16 }
  0x10   :  { %v595_v1 = vld [vmem:[#allocation2 + $0x78] sm:$0xff]  ;;  %216 = vmatpush.bf16.msra.mxu0 %v587_v0  ;;  %v594_v3 = vld [vmem:[#allocation2 + $0x70] sm:$0xff]  ;;  %v585_v4 = vld [vmem:[#allocation2 + $0x28] sm:$0xff] }
  0x11   :  { %229 = vmatpush.bf16.msra.mxu1 %v595_v1  ;;  %v593_v5 = vld [vmem:[#allocation2 + $0x68] sm:$0xff]  ;;  %v603_v6 = vld [vmem:[#allocation5 + $0x38] sm:$0xff]  ;;  %v602_v7 = vld [vmem:[#allocation5 + $0x30] sm:$0xff] }
  0x12   :  { %312 = vmatpush.bf16.msra.mxu2 %v603_v6  ;;  %v584_v8 = vld [vmem:[#allocation2 + $0x20] sm:$0xff]  ;;  %v601_v10 = vld [vmem:[#allocation5 + $0x28] sm:$0xff]  ;;  %v583_v11 = vld [vmem:[#allocation2 + $0x18] sm:$0xff] }
  0x13   :  { %v592_v9 = vld [vmem:[#allocation2 + $0x60] sm:$0xff]  ;;  %v591_v12 = vld [vmem:[#allocation2 + $0x58] sm:$0xff]  ;;  %v582_v14 = vld [vmem:[#allocation2 + $0x10] sm:$0xff] }
  0x14   :  { %217 = vmatpush.bf16.msra.mxu0 %v586_v2  ;;  %v600_v13 = vld [vmem:[#allocation5 + $0x20] sm:$0xff]  ;;  %v590_v15 = vld [vmem:[#allocation2 + $0x50] sm:$0xff]  ;;  %v599_v16 = vld [vmem:[#allocation5 + $0x18] sm:$0xff] }
  0x15   :  { %230 = vmatpush.bf16.msra.mxu1 %v594_v3  ;;  %v581_v17 = vld [vmem:[#allocation2 + $0x8] sm:$0xff]  ;;  %v598_v19 = vld [vmem:[#allocation5 + $0x10] sm:$0xff]  ;;  %v580_v20 = vld [vmem:[#allocation2] sm:$0xff] }
  0x16   :  { %313 = vmatpush.bf16.msra.mxu2 %v602_v7  ;;  %v589_v18 = vld [vmem:[#allocation2 + $0x48] sm:$0xff]  ;;  %v588_v21 = vld [vmem:[#allocation2 + $0x40] sm:$0xff]  ;;  %v611_v28 = vld [vmem:[#allocation7 + $0x38] sm:$0xff] }
  0x17   :  { %v823_v22 = vld [vmem:[%s851_s0] sm:$0xff]  ;;  %v597_v26 = vld [vmem:[#allocation5 + $0x8] sm:$0xff]  ;;  %395 = vmatpush.bf16.msra.mxu3 %v611_v28  ;;  %v610_v29 = vld [vmem:[#allocation7 + $0x30] sm:$0xff] }
  0x18   :  { %218 = vmatpush.bf16.msra.mxu0 %v585_v4  ;;  %v828_v23 = vld [vmem:[%s852_s1] sm:$0xff]  ;;  %v82_v24 = vpack.c.bf16 %v823_v22, %v823_v22  ;;  %v609_v30 = vld [vmem:[#allocation7 + $0x28] sm:$0xff]  ;;  %v607_v32 = vld [vmem:[#allocation7 + $0x18] sm:$0xff] }
  0x19   :  { %231 = vmatpush.bf16.msra.mxu1 %v593_v5  ;;  %v83_v25 = vpack.c.bf16 %v828_v23, %v828_v23  ;;  %v596_v27 = vld [vmem:[#allocation5] sm:$0xff]  ;;  %v606_v33 = vld [vmem:[#allocation7 + $0x10] sm:$0xff]  ;;  %v605_v43 = vld [vmem:[#allocation7 + $0x8] sm:$0xff] }
  0x1a   :  { %314 = vmatpush.bf16.msra.mxu2 %v601_v10  ;;  %v608_v31 = vld [vmem:[#allocation7 + $0x20] sm:$0xff] }
  0x1b   :  { %396 = vmatpush.bf16.msra.mxu3 %v610_v29  ;;  %v619_v34 = vld [vmem:[%s854_s3] ss:$0 sm:$0xff] }
  0x1c   :  { %219 = vmatpush.bf16.msra.mxu0 %v584_v8  ;;  %v604_v44 = vld [vmem:[#allocation7] sm:$0xff] }
  0x1d   :  { %232 = vmatpush.bf16.msra.mxu1 %v592_v9  ;;  %v620_v45 = vld [vmem:[%s856_s5] ss:$0 sm:$0xff]  ;;  %s759_s5 = smov [#allocation8]  }
  0x1e   :  { %315 = vmatpush.bf16.msra.mxu2 %v600_v13  ;;  %v621_v51 = vld [vmem:[%s858_s7] ss:$0 sm:$0xff]  ;;  %s423_s30 = sshll.u32 %s759_s5, 4  ;;  %s760_s7 = smov [#allocation9]   ;;  %s424_s30 = int_to_ptr.vmem [resolvable:$true] %s423_s30 }
  0x1f   :  { %397 = vmatpush.bf16.msra.mxu3 %v609_v30  ;;  %s434_s13 = sshll.u32 %s760_s7, 4  ;;  %s435_s13 = int_to_ptr.vmem [resolvable:$true] %s434_s13 }
  0x20   :  { %220 = vmatpush.bf16.msra.mxu0 %v583_v11 }
  0x21   :  { %233 = vmatpush.bf16.msra.mxu1 %v591_v12 }
  0x22   :  { %316 = vmatpush.bf16.msra.mxu2 %v599_v16 }
  0x23   :  { %398 = vmatpush.bf16.msra.mxu3 %v608_v31 }
  0x24   :  { %221 = vmatpush.bf16.msra.mxu0 %v582_v14 }
  0x25   :  { %234 = vmatpush.bf16.msra.mxu1 %v590_v15 }
  0x26   :  { %317 = vmatpush.bf16.msra.mxu2 %v598_v19 }
  0x27   :  { %399 = vmatpush.bf16.msra.mxu3 %v607_v32 }
  0x28   :  { %222 = vmatpush.bf16.msra.mxu0 %v581_v17 }
  0x29   :  { %235 = vmatpush.bf16.msra.mxu1 %v589_v18 }
  0x2a   :  { %318 = vmatpush.bf16.msra.mxu2 %v597_v26 }
  0x2b   :  { %400 = vmatpush.bf16.msra.mxu3 %v606_v33 }
  0x2c   :  { %223 = vmatpush.bf16.msra.mxu0 %v580_v20 }
  0x2d   :  { %236 = vmatpush.bf16.msra.mxu1 %v588_v21 }
  0x2e   :  { %319 = vmatpush.bf16.msra.mxu2 %v596_v27 }
  0x2f   :  { %224 = vmatmul.bf16.vlgmr.msra.gmra.mxu0 %v82_v24  ;;  %401 = vmatpush.bf16.msra.mxu3 %v605_v43 }
  0x30   :  { %237 = vmatmul.bf16.vlgmr.msra.gmra.mxu1 %v83_v25 }
  0x33   :  { %402 = vmatpush.bf16.msra.mxu3 %v604_v44 }
  0xac   :  { %v225_v35 = vpop.f32.mrf.mxu0 }
  0xad   :  { %v238_v36 = vpop.f32.mrf.mxu1  ;;  %v226_v37 = vadd.f32 %v619_v34, %v225_v35 }
  0xaf   :  { %v239_v38 = vadd.f32 %v238_v36, %v226_v37 }
  0xb1   :  { %v242_v39 = vmax.f32 %v239_v38, 0.0 }
  0xb3   :  { %v243_v40 = vpack.c.bf16 %v242_v39, %v242_v39 }
  0xb4   :  { %v227_v41 = vpop.f32.mrf.mxu0 }
  0xb5   :  { %v240_v42 = vpop.f32.mrf.mxu1  ;;  %320 = vmatmul.bf16.vlgmr.msra.gmra.mxu2 %v243_v40 }
 0x138   :  { %v321_v46 = vpop.f32.mrf.mxu2 }
 0x139   :  { %v322_v47 = vadd.f32 %v620_v45, %v321_v46 }
 0x13b   :  { %v325_v48 = vmax.f32 %v322_v47, 0.0 }
 0x13d   :  { %v326_v49 = vpack.c.bf16 %v325_v48, %v325_v48 }
 0x13f   :  { %403 = vmatmul.bf16.vlgmr.msra.gmra.mxu3 %v326_v49 }
 0x140   :  { %v323_v50 = vpop.f32.mrf.mxu2 }
 0x1c2   :  { %v404_v52 = vpop.f32.mrf.mxu3 }
 0x1c3   :  { %v405_v53 = vadd.f32 %v621_v51, %v404_v52 }
 0x1c5   :  { %v408_v54 = vsub.f32 0.0, %v405_v53 }
 0x1c7   :  { %v409_v55 = vmul.f32 1.442695, %v408_v54 }
 0x1c9   :  { %622 = vpow2.f32 %v409_v55 }
 0x1ca   :  { %v406_v56 = vpop.f32.mrf.mxu3 }
 0x1cf   :  { %v623_v57 = vpop.eup %622 }
 0x1d0   :  { %v411_v58 = vadd.f32 1.0, %v623_v57 }
 0x1d2   :  { %624 = vrcp.f32 %v411_v58 }
 0x1d8   :  { %v625_v59 = vpop.eup %624 }
 0x1d9   :  { %413 = vst [vmem:[#allocation8] sm:$0xff] %v625_v59  ;;  %v414_v60 = vsub.f32 %v823_v22, %v625_v59 }
 0x1da   :  { %428 = dma.vmem_to_hbm [thread:$0]  %s424_s30, 128, %s426_s12, [#allocation4]  }
 0x1db   :  { %v415_v61 = vmul.f32 %v414_v60, %v828_v23 }
 0x1dd   :  { %v416_v62 = vadd.f32 %v625_v59, %v415_v61 }
 0x1df   :  { %417 = vst [vmem:[#allocation9] sm:$0xff] %v416_v62 }
 0x1e0   :  { %439 = dma.vmem_to_hbm [thread:$0]  %s435_s13, 128, %s437_s16, [#allocation10]  }
 0x1e1   :  { %750 = dma.done.wait [#allocation4], 128  }
 0x1e2   :  { %751 = vsyncadd [#allocation4], 4294967168 }
 0x1e3   :  { %752 = dma.done.wait [#allocation10], 128  }
 0x1e4   :  { %753 = vsyncadd [#allocation10], 4294967168 }
 0x1e5   :  { %448 = vsyncpa [#allocation3], 1 }
 0x1e6   :  { %449 = vsyncpa [#allocation6], 1 }
 0x1e7   :  { %450 = vsyncpa [#allocation4], 1 }
 0x1e8   :  { %451 = vsyncpa [#allocation10], 1 }

</bundles_post_ra>
